<compile_context>
chip_gen: v6e
topology: v6e:2x2x1
jax: 0.10.0
libtpu: 0.0.40
codegen_flags: <defaults>
</compile_context>

<pallas_src>
import functools

import jax
import jax.numpy as jnp
from jax.experimental import pallas as pl
from jax.experimental.pallas import tpu as pltpu


def _round_up(n, m):
    return ((n + m - 1) // m) * m


# ----------------------------- Pallas kernel ------------------------------- #
def _dueling_kernel(x_ref, wc_ref, bc_ref, w1_ref, b1_ref, w4_ref, b4_ref,
                    o_ref):
    # x: (bm, S) f32 tile -> bf16 for the MXU (cast is free VPU work here).
    x = x_ref[...].astype(jnp.bfloat16)

    # Conv (block-diagonal densified): one matmul, contraction = S.
    # Feature j = l*2C + c : c < C -> value channel c, c >= C -> adv channel c-C.
    h0 = jnp.dot(x, wc_ref[...], preferred_element_type=jnp.float32)
    h0 = jnp.maximum(h0 + bc_ref[...], 0.0)                    # (bm, DMID) f32

    # Fused fc1: one matmul, contraction = DMID (>= 128).
    h1 = jnp.dot(h0.astype(jnp.bfloat16), w1_ref[...],
                 preferred_element_type=jnp.float32)
    h1 = jnp.maximum(h1 + b1_ref[...], 0.0)                    # (bm, 2H) f32

    # Fused head: col 0 = value, cols 1..A = advantage, rest zero padding.
    # 128-lane f32 output block -> unmasked, lane-dense store.
    o_ref[...] = jnp.dot(h1.astype(jnp.bfloat16), w4_ref[...],
                         preferred_element_type=jnp.float32) + b4_ref[...]


# ------------------------------- wrapper ------------------------------------ #
@functools.partial(jax.jit, static_argnums=(2,), static_argnames=("block_m",))
def dueling_forward(x, packed, action_size, *, block_m=512):
    """Forward pass matching DuelingConvSimpleQNetwork.forward."""
    B, S = x.shape
    DMID = packed["wc"].shape[1]
    H2 = packed["b1"].shape[-1]
    NPAD = packed["w4"].shape[-1]
    A = action_size

    # Batch tile: multiple of 8 sublanes, large by default (grid-step overhead
    # ~0.35us), capped at ceil(B/2) so the parallel axis has >= 2 steps (v7x).
    bm = max(8, _round_up(min(block_m, pl.cdiv(B, 2)), 8))
    B_pad = _round_up(B, bm)
    if B_pad != B:
        x = jnp.pad(x, ((0, B_pad - B), (0, 0)))

    # VMEM budget from the actual tiles (double-buffered x/out + resident
    # weights + in-kernel intermediates), with generous headroom.
    tile_bytes = bm * (S + NPAD) * 4                  # f32 input / output tiles
    interm_bytes = bm * (DMID + H2) * 6               # f32 acts + bf16 copies
    weight_bytes = sum(int(packed[k].size) * packed[k].dtype.itemsize
                       for k in ("wc", "bc", "w1", "b1", "w4", "b4"))
    vmem_limit = 2 * (2 * tile_bytes + weight_bytes) + 2 * interm_bytes
    vmem_limit = max(int(vmem_limit) + (4 << 20), 16 << 20)

    grid = (B_pad // bm,)
    out = pl.pallas_call(
        _dueling_kernel,
        out_shape=jax.ShapeDtypeStruct((B_pad, NPAD), jnp.float32),
        grid=grid,
        in_specs=[
            pl.BlockSpec((bm, S), lambda i: (i, 0)),       # x (batch-tiled)
            pl.BlockSpec((S, DMID), lambda i: (0, 0)),     # densified conv w
            pl.BlockSpec((1, DMID), lambda i: (0, 0)),     # conv bias (f32)
            pl.BlockSpec((DMID, H2), lambda i: (0, 0)),    # fused fc1 w
            pl.BlockSpec((1, H2), lambda i: (0, 0)),       # fused fc1 b (f32)
            pl.BlockSpec((H2, NPAD), lambda i: (0, 0)),    # fused head w
            pl.BlockSpec((1, NPAD), lambda i: (0, 0)),     # fused head b (f32)
        ],
        out_specs=pl.BlockSpec((bm, NPAD), lambda i: (i, 0)),
        compiler_params=pltpu.CompilerParams(
            dimension_semantics=("parallel",),
            vmem_limit_bytes=vmem_limit),
    )(x, packed["wc"], packed["bc"], packed["w1"], packed["b1"],
      packed["w4"], packed["b4"])

    # Dueling combine.  torch's adv.mean() is a GLOBAL mean over (B, A), which
    # couples all batch tiles, so this O(B*A) step runs on the real (unpadded)
    # rows, sliced immediately to the useful 1+A columns.
    out = out[:B, :1 + A]
    val = out[:, 0:1]
    adv = out[:, 1:]
    return val + adv - jnp.mean(adv)


# ------------------ parameter construction (glue, plain JAX) ----------------- #
def init_raw_params(key, state_size, action_size, node_size,
                    out_channels=5, hidsize1=128, hidsize2=128):
    """PyTorch-default U(-1/sqrt(fan_in), +) init, linear weights stored (in, out)."""
    assert hidsize1 == hidsize2, "fc1 output feeds fc4 directly in the module"
    assert state_size % node_size == 0
    L = state_size // node_size
    conv_out = out_channels * L
    ks = jax.random.split(key, 12)

    def unif(k, shape, fan_in):
        b = float(fan_in) ** -0.5
        return jax.random.uniform(k, shape, jnp.float32, -b, b)

    return dict(
        # conv weights: torch (C, 1, K) stored as (C, K)
        wcv=unif(ks[0], (out_channels, node_size), node_size),
        bcv=unif(ks[1], (out_channels,), node_size),
        wca=unif(ks[2], (out_channels, node_size), node_size),
        bca=unif(ks[3], (out_channels,), node_size),
        # linear weights stored transposed: (in, out)
        w1v=unif(ks[4], (conv_out, hidsize1), conv_out),
        b1v=unif(ks[5], (hidsize1,), conv_out),
        w4v=unif(ks[6], (hidsize2, 1), hidsize2),
        b4v=unif(ks[7], (1,), hidsize2),
        w1a=unif(ks[8], (conv_out, hidsize1), conv_out),
        b1a=unif(ks[9], (hidsize1,), conv_out),
        w4a=unif(ks[10], (hidsize2, action_size), hidsize2),
        b4a=unif(ks[11], (action_size,), hidsize2),
    )


def pack_params(raw, state_size, node_size, action_size):
    """Fuse the value/advantage streams and densify the strided conv.

    Layer 0: block-diagonal conv weight (S, DMID): W[l*K+k, l*2C+c] = wc2[k, c].
    Layer 1: fc1 rows reordered from torch's channel-major flatten (c*L + l)
             to the kernel's location-major feature order (l*2C + c).
    Layer 2: block-diagonal head, col 0 = value, cols 1..A = advantage.
    Matmul weights are stored in bfloat16 (MXU operands); biases stay f32.
    """
    C, K = raw["wcv"].shape
    L = state_size // node_size
    S = state_size
    H = raw["w1v"].shape[1]
    A = action_size
    C2 = 2 * C
    DMID = _round_up(L * C2, 128)          # lane-dense intermediate / fc1 depth
    NPAD = _round_up(1 + A, 128)           # exactly 128 for any A <= 127

    # Layer 0: densified block-diagonal conv weight.
    wc2 = jnp.concatenate([raw["wcv"].T, raw["wca"].T], axis=1)      # (K, 2C)
    wc = (jnp.eye(L, dtype=jnp.float32)[:, None, :, None]
          * wc2[None, :, None, :]).reshape(S, L * C2)
    wc = jnp.pad(wc, ((0, 0), (0, DMID - L * C2)))
    bc = jnp.tile(jnp.concatenate([raw["bcv"], raw["bca"]]), L)      # (L*2C,)
    bc = jnp.pad(bc, (0, DMID - L * C2)).reshape(1, DMID)

    # Layer 1: fused fc1, rows ordered (l, c'); c' < C value, c' >= C advantage.
    w1v = raw["w1v"].reshape(C, L, H).transpose(1, 0, 2)             # (L, C, H)
    w1a = raw["w1a"].reshape(C, L, H).transpose(1, 0, 2)
    w1 = jnp.zeros((L, C2, 2 * H), jnp.float32)
    w1 = w1.at[:, :C, :H].set(w1v)
    w1 = w1.at[:, C:, H:].set(w1a)
    w1 = w1.reshape(L * C2, 2 * H)
    w1 = jnp.pad(w1, ((0, DMID - L * C2), (0, 0)))
    b1 = jnp.concatenate([raw["b1v"], raw["b1a"]]).reshape(1, 2 * H)

    # Layer 2: fused head.
    w4 = jnp.zeros((2 * H, NPAD), jnp.float32)
    w4 = w4.at[:H, 0:1].set(raw["w4v"])
    w4 = w4.at[H:, 1:1 + A].set(raw["w4a"])
    b4 = jnp.zeros((1, NPAD), jnp.float32)
    b4 = b4.at[0, 0].set(raw["b4v"][0])
    b4 = b4.at[0, 1:1 + A].set(raw["b4a"])

    return dict(wc=wc.astype(jnp.bfloat16), bc=bc,
                w1=w1.astype(jnp.bfloat16), b1=b1,
                w4=w4.astype(jnp.bfloat16), b4=b4)


# --------------------------- pure-JAX reference ------------------------------ #
def reference_forward(x, raw):
    """Pure-JAX (f32) mirror of the PyTorch module (correctness check)."""
    B, S = x.shape
    C, K = raw["wcv"].shape
    L = S // K
    xr = x.reshape(B, L, K)

    def stream(wc, bc, w1, b1, w4, b4):
        conv = jnp.einsum("blk,ck->bcl", xr, wc) + bc[None, :, None]  # (B,C,L)
        h = jnp.maximum(conv, 0.0).reshape(B, C * L)   # channel-major flatten
        h = jnp.maximum(h @ w1 + b1, 0.0)
        return h @ w4 + b4

    val = stream(raw["wcv"], raw["bcv"], raw["w1v"], raw["b1v"],
                 raw["w4v"], raw["b4v"])
    adv = stream(raw["wca"], raw["bca"], raw["w1a"], raw["b1a"],
                 raw["w4a"], raw["b4a"])
    return val + adv - jnp.mean(adv)           # global mean, as in the module


# --------------------------------- main -------------------------------------- #
if __name__ == "__main__":
    # Small shapes consistent with the module's forward; B=30 pads to 32 and
    # runs 2 parallel grid steps of 16 rows (padding + multi-step path).
    B = 30
    state_size = 16
    node_size = 4
    action_size = 8

    key = jax.random.PRNGKey(0)
    k_x, k_p = jax.random.split(key)
    x = jax.random.normal(k_x, (B, state_size), dtype=jnp.float32)
    raw = init_raw_params(k_p, state_size, action_size, node_size)
    packed = pack_params(raw, state_size, node_size, action_size)

    out = dueling_forward(x, packed, action_size)
    out = jax.block_until_ready(out)

    ref = reference_forward(x, raw)
    assert out.shape == (B, action_size), out.shape
    # bf16 MXU operands vs. f32 reference -> ~1e-2 scale tolerance.
    assert jnp.allclose(out, ref, rtol=2e-2, atol=2e-2), (out, ref)

    print("KERNEL_OK")
</pallas_src>

<mosaic_0001>
module attributes {stable_mosaic.version = 11 : i64} {
  func.func @_dueling_kernel(%arg0: i32, %arg1: memref<16x16xf32, #tpu.memory_space<vmem>>, %arg2: memref<16x128xbf16, #tpu.memory_space<vmem>>, %arg3: memref<1x128xf32, #tpu.memory_space<vmem>>, %arg4: memref<128x256xbf16, #tpu.memory_space<vmem>>, %arg5: memref<1x256xf32, #tpu.memory_space<vmem>>, %arg6: memref<256x128xbf16, #tpu.memory_space<vmem>>, %arg7: memref<1x128xf32, #tpu.memory_space<vmem>>, %arg8: memref<16x128xf32, #tpu.memory_space<vmem>>) attributes {dimension_semantics = [#tpu.dimension_semantics<parallel>], iteration_bounds = array<i64: 2>, scalar_prefetch = 0 : i64, scratch_operands = 0 : i64, tpu.core_type = #tpu.core_type<tc>, window_params = [{transform_indices = @transform_0, window_bounds = array<i64: 16, 16>}, {pipeline_mode = #tpu.pipeline_mode<synchronous>, transform_indices = @transform_1, window_bounds = array<i64: 16, 128>}, {pipeline_mode = #tpu.pipeline_mode<synchronous>, transform_indices = @transform_2, window_bounds = array<i64: 1, 128>}, {pipeline_mode = #tpu.pipeline_mode<synchronous>, transform_indices = @transform_3, window_bounds = array<i64: 128, 256>}, {pipeline_mode = #tpu.pipeline_mode<synchronous>, transform_indices = @transform_4, window_bounds = array<i64: 1, 256>}, {pipeline_mode = #tpu.pipeline_mode<synchronous>, transform_indices = @transform_5, window_bounds = array<i64: 256, 128>}, {pipeline_mode = #tpu.pipeline_mode<synchronous>, transform_indices = @transform_6, window_bounds = array<i64: 1, 128>}, {transform_indices = @transform_7, window_bounds = array<i64: 16, 128>}]} {
    %c0 = arith.constant 0 : index
    %c0_0 = arith.constant 0 : index
    %0 = vector.load %arg1[%c0, %c0_0] : memref<16x16xf32, #tpu.memory_space<vmem>>, vector<16x16xf32>
    %1 = arith.truncf %0 : vector<16x16xf32> to vector<16x16xbf16>
    %c0_1 = arith.constant 0 : index
    %c0_2 = arith.constant 0 : index
    %2 = vector.load %arg2[%c0_1, %c0_2] : memref<16x128xbf16, #tpu.memory_space<vmem>>, vector<16x128xbf16>
    %cst = arith.constant dense<0.000000e+00> : vector<16x128xf32>
    %3 = tpu.matmul %1, %2, %cst {dimension_numbers = #tpu.dot_dimension_numbers<[1], [0], [0], [1], [0, 0, 1, 1], [], []>} : vector<16x16xbf16>, vector<16x128xbf16>, vector<16x128xf32> -> vector<16x128xf32>
    %c0_3 = arith.constant 0 : index
    %c0_4 = arith.constant 0 : index
    %4 = vector.load %arg3[%c0_3, %c0_4] : memref<1x128xf32, #tpu.memory_space<vmem>>, vector<1x128xf32>
    %5 = vector.broadcast %4 : vector<1x128xf32> to vector<16x128xf32>
    %6 = arith.addf %3, %5 : vector<16x128xf32>
    %cst_5 = arith.constant 0.000000e+00 : f32
    %7 = vector.broadcast %cst_5 : f32 to vector<16x128xf32>
    %8 = arith.maximumf %6, %7 : vector<16x128xf32>
    %9 = arith.truncf %8 : vector<16x128xf32> to vector<16x128xbf16>
    %c0_6 = arith.constant 0 : index
    %c0_7 = arith.constant 0 : index
    %10 = vector.load %arg4[%c0_6, %c0_7] : memref<128x256xbf16, #tpu.memory_space<vmem>>, vector<128x256xbf16>
    %cst_8 = arith.constant dense<0.000000e+00> : vector<16x256xf32>
    %11 = tpu.matmul %9, %10, %cst_8 {dimension_numbers = #tpu.dot_dimension_numbers<[1], [0], [0], [1], [0, 0, 1, 1], [], []>} : vector<16x128xbf16>, vector<128x256xbf16>, vector<16x256xf32> -> vector<16x256xf32>
    %c0_9 = arith.constant 0 : index
    %c0_10 = arith.constant 0 : index
    %12 = vector.load %arg5[%c0_9, %c0_10] : memref<1x256xf32, #tpu.memory_space<vmem>>, vector<1x256xf32>
    %13 = vector.broadcast %12 : vector<1x256xf32> to vector<16x256xf32>
    %14 = arith.addf %11, %13 : vector<16x256xf32>
    %cst_11 = arith.constant 0.000000e+00 : f32
    %15 = vector.broadcast %cst_11 : f32 to vector<16x256xf32>
    %16 = arith.maximumf %14, %15 : vector<16x256xf32>
    %17 = arith.truncf %16 : vector<16x256xf32> to vector<16x256xbf16>
    %c0_12 = arith.constant 0 : index
    %c0_13 = arith.constant 0 : index
    %18 = vector.load %arg6[%c0_12, %c0_13] : memref<256x128xbf16, #tpu.memory_space<vmem>>, vector<256x128xbf16>
    %cst_14 = arith.constant dense<0.000000e+00> : vector<16x128xf32>
    %19 = tpu.matmul %17, %18, %cst_14 {dimension_numbers = #tpu.dot_dimension_numbers<[1], [0], [0], [1], [0, 0, 1, 1], [], []>} : vector<16x256xbf16>, vector<256x128xbf16>, vector<16x128xf32> -> vector<16x128xf32>
    %c0_15 = arith.constant 0 : index
    %c0_16 = arith.constant 0 : index
    %20 = vector.load %arg7[%c0_15, %c0_16] : memref<1x128xf32, #tpu.memory_space<vmem>>, vector<1x128xf32>
    %21 = vector.broadcast %20 : vector<1x128xf32> to vector<16x128xf32>
    %22 = arith.addf %19, %21 : vector<16x128xf32>
    %c0_17 = arith.constant 0 : index
    %c0_18 = arith.constant 0 : index
    %23 = vector.load %arg8[%c0_17, %c0_18] : memref<16x128xf32, #tpu.memory_space<vmem>>, vector<16x128xf32>
    tpu.vector_store %arg8[%c0_17, %c0_18], %22 {strides = array<i32>} : memref<16x128xf32, #tpu.memory_space<vmem>>, vector<16x128xf32>,
    return
  }
  func.func @transform_0(%arg0: i32) -> (i32, i32) {
    %c0_i32 = arith.constant 0 : i32
    %c0_i32_0 = arith.constant 0 : i32
    return %arg0, %c0_i32 : i32, i32
  }
  func.func @transform_1(%arg0: i32) -> (i32, i32) {
    %c0_i32 = arith.constant 0 : i32
    %c0_i32_0 = arith.constant 0 : i32
    %c0_i32_1 = arith.constant 0 : i32
    return %c0_i32, %c0_i32_0 : i32, i32
  }
  func.func @transform_2(%arg0: i32) -> (i32, i32) {
    %c0_i32 = arith.constant 0 : i32
    %c0_i32_0 = arith.constant 0 : i32
    %c0_i32_1 = arith.constant 0 : i32
    return %c0_i32, %c0_i32_0 : i32, i32
  }
  func.func @transform_3(%arg0: i32) -> (i32, i32) {
    %c0_i32 = arith.constant 0 : i32
    %c0_i32_0 = arith.constant 0 : i32
    %c0_i32_1 = arith.constant 0 : i32
    return %c0_i32, %c0_i32_0 : i32, i32
  }
  func.func @transform_4(%arg0: i32) -> (i32, i32) {
    %c0_i32 = arith.constant 0 : i32
    %c0_i32_0 = arith.constant 0 : i32
    %c0_i32_1 = arith.constant 0 : i32
    return %c0_i32, %c0_i32_0 : i32, i32
  }
  func.func @transform_5(%arg0: i32) -> (i32, i32) {
    %c0_i32 = arith.constant 0 : i32
    %c0_i32_0 = arith.constant 0 : i32
    %c0_i32_1 = arith.constant 0 : i32
    return %c0_i32, %c0_i32_0 : i32, i32
  }
  func.func @transform_6(%arg0: i32) -> (i32, i32) {
    %c0_i32 = arith.constant 0 : i32
    %c0_i32_0 = arith.constant 0 : i32
    %c0_i32_1 = arith.constant 0 : i32
    return %c0_i32, %c0_i32_0 : i32, i32
  }
  func.func @transform_7(%arg0: i32) -> (i32, i32) {
    %c0_i32 = arith.constant 0 : i32
    %c0_i32_0 = arith.constant 0 : i32
    return %arg0, %c0_i32 : i32, i32
  }
}

</mosaic_0001>

<bundles_post_ra>
// kernel: dueling_forward.1
= control target key start
LH: loop header
LB: loop body
LE: loop exit
PB: predicated region body
PF: predicated region fallthrough
CT: control target
= control target key end

     0   :  { %12 = vsyncpa [#allocation3], 0  ;;  %s1151_s0 = inlined_call_operand.vmem [shape: f32[32,16], index: 0, kind: input, shape index: {}]   ;;  %s1152_s1 = inlined_call_operand.vmem [shape: bf16[16,128], index: 1, kind: input, shape index: {}]   ;;  %s1153_s2 = inlined_call_operand.vmem [shape: f32[1,128], index: 2, kind: input, shape index: {}]   ;;  %s1154_s3 = inlined_call_operand.hbm [shape: bf16[128,256], index: 3, kind: input, shape index: {}]   ;;  %s1155_s4 = inlined_call_operand.vmem [shape: f32[1,256], index: 4, kind: input, shape index: {}]   ;;  %s1156_s5 = inlined_call_operand.hbm [shape: bf16[256,128], index: 5, kind: input, shape index: {}]   ;;  %s1157_s6 = inlined_call_operand.vmem [shape: f32[1,128], index: 6, kind: input, shape index: {}]   ;;  %s1158_s7 = inlined_call_operand.vmem [shape: f32[32,128], index: 7, kind: output, shape index: {}]  }
   0x1   :  { %13 = vsyncpa [#allocation5], 0  ;;  %s1067_s24 = smov 0  }
   0x2 LB: > { %s1018_s25 = smov [#allocation2]   ;;  %s792_s27 = sadd.s32 4294967295, %s1016_s24   ;;  %s1016_s24 = sphi %s1067_s24, %s19_s24  }
   0x3   : > { %s220_s26 = sshll.u32 %s1018_s25, 4  ;;  %p794_p0 = scmp.ge.s32.totalorder %s1016_s24, 1  ;;  %s221_s26 = int_to_ptr.vmem [resolvable:$true] %s220_s26 }
   0x4   : > { %p202_p1 = scmp.lt.s32.totalorder %s1016_s24, 3  ;;  %p1081_p3 = scmp.eq.s32.totalorder %s792_s27, 0 }
   0x5   : > { %s1019_s30 = smov [#allocation4]   ;;  %s961_s10 = scalar_lea.vmem %s221_s26, 2048 }
   0x6   : > { %p1075_p2 = pnand %p794_p0, %p202_p1  ;;  %s236_s8 = sshll.u32 %s1019_s30, 4  ;;  %s237_s8 = int_to_ptr.vmem [resolvable:$true] %s236_s8 }
   0x7   : > { %p962_p7 = scmp.ne.s32.totalorder %s221_s26, %s961_s10  ;;  %p969_p10 = scmp.lt.s32.totalorder %s221_s26, %s221_s26 }
   0x8   : > { %p881_p4 = pneg %p1075_p2  ;;  %p970_p11 = scmp.lt.s32.totalorder %s961_s10, %s961_s10 }
   0xa   : > { %p1089_p5 = pnand %p1081_p3, %p881_p4  ;;  %p971_p12 = por %p970_p11, %p969_p10 }
   0xc   : > { %p952_p6 = pneg %p1089_p5 }
   0xe   : > { %p964_p8 = pnand %p962_p7, %p952_p6 }
  0x10   : > { %p965_p9 = pneg %p964_p8 }
  0x12   : > { %p972_p13 = pnand %p971_p12, %p965_p9 }
  0x14   : > { %975 = shalt.err (!%p972_p13)
}
  0x15   : > { %s1020_s11 = smov 128   ;;  %s1021_s12 = smov 8  }
  0x16   : > { %884 = dma.hbm_to_vmem [thread:$0]  (!%p1089_p5), %s1154_s3, 2048, %s221_s26, [#allocation3], %s1020_s11, %s1020_s11, %s1021_s12  }
  0x17   : > { %s987_s15 = scalar_lea.vmem %s237_s8, 2048  ;;  %p995_p7 = scmp.lt.s32.totalorder %s237_s8, %s237_s8 }
  0x18   : > { %p988_p0 = scmp.ne.s32.totalorder %s237_s8, %s987_s15  ;;  %p996_p8 = scmp.lt.s32.totalorder %s987_s15, %s987_s15 }
  0x1a   : > { %p990_p1 = pnand %p988_p0, %p952_p6  ;;  %p997_p10 = por %p996_p8, %p995_p7 }
  0x1c   : > { %p991_p4 = pneg %p990_p1 }
  0x1e   : > { %p998_p9 = pnand %p997_p10, %p991_p4 }
  0x20   : > { %1001 = shalt.err (!%p998_p9)
}
  0x21   : > { %s1022_s16 = smov 64   ;;  %s1023_s17 = smov 4  }
  0x22   : > { %887 = dma.hbm_to_vmem [thread:$0]  (!%p1089_p5), %s1156_s5, 2048, %s237_s8, [#allocation5], %s1022_s16, %s1022_s16, %s1023_s17  }
  0x23   : > { %264 = sbr.rel (%p1075_p2) target bundleno = 665 (0x299), region = 48 }
  0x28   : > { %1007 = dma.done.wait (%p1081_p3), [#allocation3], 2048  }
  0x29   : > { %1009 = vsyncadd (%p1081_p3), [#allocation3], 4294965248 }
  0x2a   : > { %1011 = dma.done.wait (%p1081_p3), [#allocation5], 2048  }
  0x2b   : > { %1013 = vsyncadd (%p1081_p3), [#allocation5], 4294965248  ;;  %s801_s20 = sshll.u32 %s792_s27, 1  ;;  %v1024_v0 = vmov 0.0   ;;  %vm1025_vm0 = vmmov 0   ;;  %v909_v1 = vld [vmem:[%s1152_s1] sm:$0xff]   ;;  %v397_v48 = vlaneseq }
  0x2c   : > { %867 = vmatprep.subr.bf16.mxu0 %v1024_v0  ;;  %869 = vmatprep.mubr.msk.bf16.mxu0 %vm1025_vm0, %v1024_v0  ;;  %p301_p2 = scmp.lt.s32.totalorder %s801_s20, 3  ;;  %vm331_vm1 = vcmask 130048   ;;  %v910_v5 = vld [vmem:[#allocation2 + $0x74] ss:$8 sps:$4 sm:$0xff]   ;;  %v912_v6 = vld [vmem:[#allocation2 + $0x70] ss:$8 sps:$4 sm:$0xff]  }
  0x2d   : > { %868 = vmatpush3.bf16.msra.mxu0 %v909_v1  ;;  %v913_v7 = vld [vmem:[#allocation2 + $0x64] ss:$8 sps:$4 sm:$0xff]   ;;  %487 = vmatprep.subr.bf16.mxu1 %v910_v5  ;;  %v915_v8 = vld [vmem:[#allocation2 + $0x60] ss:$8 sps:$4 sm:$0xff]   ;;  %v916_v9 = vld [vmem:[#allocation2 + $0x54] ss:$8 sps:$4 sm:$0xff]  }
  0x2e   : > { %s1163_s20 = smov (!%p301_p2, %s801_s20), 3  ;;  %488 = vmatpush1.bf16.msra.mxu1 %v912_v6  ;;  %v918_v10 = vld [vmem:[#allocation2 + $0x50] ss:$8 sps:$4 sm:$0xff]   ;;  %v919_v11 = vld [vmem:[#allocation2 + $0x44] ss:$8 sps:$4 sm:$0xff]   ;;  %v1026_v21 = vmov 0  }
  0x2f   : > { %s802_s21 = sshll.u32 %s1163_s20, 3  ;;  %489 = vmatprep.subr.bf16.mxu1 %v913_v7  ;;  %v921_v12 = vld [vmem:[#allocation2 + $0x40] ss:$8 sps:$4 sm:$0xff]   ;;  %v922_v13 = vld [vmem:[#allocation2 + $0x34] ss:$8 sps:$4 sm:$0xff]   ;;  %519 = vmatprep.mubr.bf16.mxu1 %v1026_v21  ;;  %v398_v49 = vshrl.u32 %v397_v48, 7 }
  0x30   : > { %s304_s25 = scalar_lea.vmem %s1151_s0, %s802_s21  ;;  %v924_v14 = vld [vmem:[#allocation2 + $0x30] ss:$8 sps:$4 sm:$0xff]   ;;  %v925_v15 = vld [vmem:[#allocation2 + $0x24] ss:$8 sps:$4 sm:$0xff]   ;;  %v927_v16 = vld [vmem:[#allocation2 + $0x20] ss:$8 sps:$4 sm:$0xff]   ;;  %s310_s13 = scalar_lea.vmem %s1158_s7, %s802_s21 }
  0x31   : > { %v313_v2 = vld [vmem:[%s304_s25] sm:$0xff]  ;;  %v314_v3 = vld [vmem:[%s304_s25 + $0x8] sm:$0xff]  ;;  %v928_v17 = vld [vmem:[#allocation2 + $0x14] ss:$8 sps:$4 sm:$0xff]   ;;  %v403_v50 = vsub.s32 1, %v398_v49  ;;  %v399_v51 = vsub.s32 0, %v398_v49 }
  0x32   : > { %v315_v4 = vpack.c.bf16 %v314_v3, %v313_v2  ;;  %490 = vmatpush1.bf16.msra.mxu1 %v915_v8  ;;  %v930_v18 = vld [vmem:[#allocation2 + $0x10] ss:$8 sps:$4 sm:$0xff]   ;;  %v931_v19 = vld [vmem:[#allocation2 + $0x4] ss:$8 sps:$4 sm:$0xff]   ;;  %v933_v20 = vld [vmem:[#allocation2] ss:$8 sps:$4 sm:$0xff]  }
  0x33   : > { %491 = vmatprep.subr.bf16.mxu1 %v916_v9  ;;  %v934_v22 = vld [vmem:[#allocation4 + $0x78] sm:$0xff]   ;;  %v936_v24 = vld [vmem:[#allocation4 + $0x70] sm:$0xff]   ;;  %v938_v26 = vld [vmem:[#allocation4 + $0x68] sm:$0xff]  }
  0x34   : > { %870 = vmatmul.mubr.msk.bf16.vlgmr.msra.gmra.mxu0 %vm331_vm1, %v315_v4  ;;  %v935_v23 = vld [vmem:[#allocation4 + $0x38] sm:$0xff]   ;;  %845 = vmatprep.subr.bf16.mxu0 %v934_v22  ;;  %v937_v25 = vld [vmem:[#allocation4 + $0x30] sm:$0xff]   ;;  %v939_v27 = vld [vmem:[#allocation4 + $0x28] sm:$0xff]  }
  0x35   : > { %846 = vmatpush3.bf16.msra.mxu0 %v935_v23  ;;  %v940_v28 = vld [vmem:[#allocation4 + $0x60] sm:$0xff]   ;;  %v942_v30 = vld [vmem:[#allocation4 + $0x58] sm:$0xff]   ;;  %v944_v42 = vld [vmem:[#allocation4 + $0x50] sm:$0xff]  }
  0x36   : > { %492 = vmatpush1.bf16.msra.mxu1 %v918_v10  ;;  %847 = vmatprep.subr.bf16.mxu0 %v936_v24  ;;  %v941_v29 = vld [vmem:[#allocation4 + $0x20] sm:$0xff]   ;;  %v943_v31 = vld [vmem:[#allocation4 + $0x18] sm:$0xff]   ;;  %v945_v43 = vld [vmem:[#allocation4 + $0x10] sm:$0xff]  }
  0x37   : > { %493 = vmatprep.subr.bf16.mxu1 %v919_v11  ;;  %v805_v32 = vld [vmem:[%s1153_s2] ss:$0 sm:$0xff]  ;;  %v946_v44 = vld [vmem:[#allocation4 + $0x48] sm:$0xff]  }
  0x38   : > { %v947_v45 = vld [vmem:[#allocation4 + $0x8] sm:$0xff]   ;;  %v948_v46 = vld [vmem:[#allocation4 + $0x40] sm:$0xff]  }
  0x39   : > { %848 = vmatpush3.bf16.msra.mxu0 %v937_v25  ;;  %v949_v47 = vld [vmem:[#allocation4] sm:$0xff]  }
  0x3a   : > { %494 = vmatpush1.bf16.msra.mxu1 %v921_v12  ;;  %849 = vmatprep.subr.bf16.mxu0 %v938_v26  ;;  %v395_v52 = vld [vmem:[%s1155_s4] sm:$0x3] }
  0x3b   : > { %495 = vmatprep.subr.bf16.mxu1 %v922_v13  ;;  %v404_v54 = vrot.slane %v395_v52, %v403_v50  ;;  %v400_v55 = vrot.slane %v395_v52, %v399_v51  ;;  %v824_v6 = vld [vmem:[%s1157_s6] ss:$0 sm:$0xff] }
  0x3d   : > { %850 = vmatpush3.bf16.msra.mxu0 %v939_v27 }
  0x3e   : > { %496 = vmatpush1.bf16.msra.mxu1 %v924_v14  ;;  %851 = vmatprep.subr.bf16.mxu0 %v940_v28 }
  0x3f   : > { %497 = vmatprep.subr.bf16.mxu1 %v925_v15 }
  0x41   : > { %852 = vmatpush3.bf16.msra.mxu0 %v941_v29 }
  0x42   : > { %498 = vmatpush1.bf16.msra.mxu1 %v927_v16  ;;  %853 = vmatprep.subr.bf16.mxu0 %v942_v30 }
  0x43   : > { %499 = vmatprep.subr.bf16.mxu1 %v928_v17 }
  0x45   : > { %854 = vmatpush3.bf16.msra.mxu0 %v943_v31 }
  0x46   : > { %500 = vmatpush1.bf16.msra.mxu1 %v930_v18  ;;  %855 = vmatprep.subr.bf16.mxu0 %v944_v42 }
  0x47   : > { %501 = vmatprep.subr.bf16.mxu1 %v931_v19 }
  0x49   : > { %856 = vmatpush3.bf16.msra.mxu0 %v945_v43 }
  0x4a   : > { %502 = vmatpush1.bf16.msra.mxu1 %v933_v20  ;;  %857 = vmatprep.subr.bf16.mxu0 %v946_v44 }
  0x4d   : > { %858 = vmatpush3.bf16.msra.mxu0 %v947_v45 }
  0x4e   : > { %859 = vmatprep.subr.bf16.mxu0 %v948_v46 }
  0x51   : > { %860 = vmatpush3.bf16.msra.mxu0 %v949_v47 }
  0xf4   : > { %v369_v33 = vpop.f32.mrf.mxu0 }
  0xf5   : > { %v370_v35 = vadd.f32 %v805_v32, %v369_v33 }
  0xf6   : > { %v871_v34 = vpop.f32.mrf.mxu0 }
  0xf7   : > { %v376_v39 = vmax.f32 %v370_v35, 0.0 }
  0xf8   : > { %v372_v36 = vpop.f32.mrf.mxu0 }
  0xf9   : > { %v373_v37 = vadd.f32 %v805_v32, %v372_v36 }
  0xfa   : > { %v872_v38 = vpop.f32.mrf.mxu0 }
  0xfb   : > { %v377_v40 = vmax.f32 %v373_v37, 0.0 }
  0xfd   : > { %v378_v41 = vpack.c.bf16 %v377_v40, %v376_v39 }
  0xff   : > { %520 = vmatmul.mubr.bf16.vlgmr.msra.gmra.mxu1 %v378_v41 }
 0x1bf   : > { %v521_v53 = vpop.f32.mrf.mxu1 }
 0x1c0   : > { %v522_v60 = vadd.f32 %v521_v53, %v400_v55 }
 0x1c1   : > { %v523_v56 = vpop.f32.mrf.mxu1 }
 0x1c2   : > { %v524_v58 = vadd.f32 %v523_v56, %v404_v54  ;;  %v530_v2 = vmax.f32 %v522_v60, 0.0 }
 0x1c3   : > { %v525_v57 = vpop.f32.mrf.mxu1 }
 0x1c4   : > { %v526_v59 = vadd.f32 %v525_v57, %v400_v55  ;;  %v531_v0 = vmax.f32 %v524_v58, 0.0 }
 0x1c5   : > { %v527_v61 = vpop.f32.mrf.mxu1 }
 0x1c6   : > { %v528_v62 = vadd.f32 %v527_v61, %v404_v54  ;;  %v532_v63 = vmax.f32 %v526_v59, 0.0 }
 0x1c8   : > { %v533_v1 = vmax.f32 %v528_v62, 0.0  ;;  %v534_v4 = vpack.c.bf16 %v532_v63, %v530_v2 }
 0x1ca   : > { %v535_v3 = vpack.c.bf16 %v533_v1, %v531_v0 }
 0x1cc   : > { %703 = vmatprep.mubr.bf16.mxu0 %v535_v3 }
 0x1cd   : > { %704 = vmatmul.mubr.bf16.vlgmr.msra.gmra.mxu0 %v534_v4 }
 0x28d   : > { %v861_v5 = vpop.f32.mrf.mxu0 }
 0x28f   : > { %v862_v7 = vpop.f32.mrf.mxu0 }
 0x290   : > { %v863_v8 = vadd.f32 %v862_v7, %v861_v5 }
 0x291   : > { %v864_v9 = vpop.f32.mrf.mxu0 }
 0x292   : > { %v706_v10 = vadd.f32 %v863_v8, %v824_v6 }
 0x293   : > { %v865_v11 = vpop.f32.mrf.mxu0 }
 0x294   : > { %712 = vst [vmem:[%s310_s13] sm:$0xff] %v706_v10  ;;  %v866_v12 = vadd.f32 %v865_v11, %v864_v9 }
 0x296   : > { %v709_v13 = vadd.f32 %v866_v12, %v824_v6 }
 0x298   : > { %713 = vst [vmem:[%s310_s13 + $0x8] sm:$0xff] %v709_v13 }
 0x299 PF: > { %s19_s24 = sadd.s32 1, %s1016_s24  }
 0x29a   : > { %p16_p3 = scmp.ge.s32.totalorder %s19_s24, 4  }
 0x29c   :  { %18 = sbr.rel (!%p16_p3) target bundleno = 2 (0x2), region = 87 }
 0x2a1   :  { %736 = vsyncpa [#allocation3], 1 }
 0x2a2   :  { %738 = vsyncpa [#allocation3 + $0x1], 1 }
 0x2a3   :  { %739 = vsyncpa [#allocation5], 1 }

</bundles_post_ra>
